<compile_context>
chip_gen: v7x
topology: tpu7x:2x2x1
jax: 0.10.0
libtpu: 0.0.40
codegen_flags: <defaults>
</compile_context>

<pallas_src>
import jax
import jax.numpy as jnp
import numpy as np
from jax.experimental import pallas as pl
from jax.experimental.pallas import tpu as pltpu


# ----------------------------------------------------------------------------
# Tile selection
# ----------------------------------------------------------------------------
def _pick_row_tile(H, W, Cin, Cout, *, need_even, budget_bytes=20 * 1024 * 1024):
    """Largest row-band TH (divisor of H, even when pooling is fused) whose
    per-step VMEM footprint (double-buffered blocks + in-kernel temporaries)
    fits the budget."""

    def footprint(th):
        bf16 = 2
        in_blk = 2 * th * (W + 2) * Cin * bf16            # body block (x2 buf)
        halo = 2 * 2 * (W + 2) * Cin * bf16                # two 1-row halos
        w_blk = 2 * 9 * Cin * Cout * bf16                  # weights (x2 buf)
        out_blk = 2 * th * W * Cout * bf16                 # full-res output
        pool_blk = 2 * (th // 2) * (W // 2) * Cout * bf16  # pooled output
        acc = th * W * Cout * 4                            # f32 accumulator
        lhs = th * W * 3 * Cin * bf16                      # per-ky LHS temp
        band = (th + 2) * (W + 2) * Cin * bf16             # concatenated band
        return in_blk + halo + w_blk + out_blk + pool_blk + acc + lhs + band

    best = None
    for th in range(1, H + 1):
        if H % th:
            continue
        if need_even and th % 2:
            continue
        if footprint(th) <= budget_bytes:
            best = th
    if best is None:                                       # smallest legal tile
        best = 2 if need_even else 1
    return best


# ----------------------------------------------------------------------------
# Pallas kernels
# ----------------------------------------------------------------------------
def _conv_body(xa_ref, xb0_ref, xb1_ref, w_ref, b_ref, o_ref, p_ref):
    # xa_ref : (1, TH, W+2, Cin)      bf16 body rows [t*TH, t*TH+TH) of padded x
    # xb0/1  : (1, 1,  W+2, Cin)      bf16 halo rows t*TH+TH, t*TH+TH+1
    # w_ref  : (3, 3*Cin, Cout)       bf16, index (ky, kx*Cin+ci, co)
    # b_ref  : (1, Cout)              f32
    # o_ref  : (1, TH, W, Cout)       bf16 relu(conv)
    # p_ref  : (1, TH//2, W//2, Cout) bf16 2x2-maxpooled relu(conv), or None
    _, TH, Wp2, Cin = xa_ref.shape
    _, _, W, Cout = o_ref.shape
    K = 3 * Cin

    # Padded row band for this tile: (TH+2, W+2, Cin), already bf16.
    band = jnp.concatenate([xa_ref[0], xb0_ref[0], xb1_ref[0]], axis=0)

    # One (TH*W, 3*Cin) x (3*Cin, Cout) MXU matmul per ky tap: kx taps folded
    # into the contraction, all TH output rows batched into M = TH*W, f32
    # accumulation seeded by the broadcast bias.
    acc = jnp.broadcast_to(b_ref[...].astype(jnp.float32), (TH * W, Cout))
    for ky in range(3):
        rows = band[ky:ky + TH]                                 # (TH, W+2, Cin)
        lhs = jnp.concatenate(
            [rows[:, 0:W], rows[:, 1:W + 1], rows[:, 2:W + 2]], axis=-1)
        acc = acc + jnp.dot(lhs.reshape(TH * W, K), w_ref[ky],
                            preferred_element_type=jnp.float32)

    y = jnp.maximum(acc, 0.0).reshape(TH, W, Cout)
    o_ref[0] = y.astype(o_ref.dtype)

    if p_ref is not None:
        # Fused 2x2 max-pool epilogue (value-level reshapes only; no strided
        # Ref indexing, which the interpret path rejects).
        THo, Wo = TH // 2, W // 2
        r = jnp.max(y.reshape(THo, 2, W, Cout), axis=1)         # row pairs
        p = jnp.max(r.reshape(THo, Wo, 2, Cout), axis=2)        # column pairs
        p_ref[0] = p.astype(p_ref.dtype)


def _conv3x3_relu_kernel(xa_ref, xb0_ref, xb1_ref, w_ref, b_ref, o_ref):
    _conv_body(xa_ref, xb0_ref, xb1_ref, w_ref, b_ref, o_ref, None)


def _conv3x3_relu_pool_kernel(xa_ref, xb0_ref, xb1_ref, w_ref, b_ref, o_ref, p_ref):
    _conv_body(xa_ref, xb0_ref, xb1_ref, w_ref, b_ref, o_ref, p_ref)


# ----------------------------------------------------------------------------
# Wrapper (plain-JAX glue: padding, BlockSpecs, grid)
# ----------------------------------------------------------------------------
def conv3x3_relu(x_nhwc, w, b, *, pool=False):
    """3x3 'SAME' conv + bias + ReLU (NHWC / HWIO), optionally fused 2x2 maxpool.

    Activations are carried in bf16; accumulation is f32 in-kernel.
    Returns the bf16 feature map, or (full_map, pooled_map) when pool=True."""
    N, H, W, Cin = x_nhwc.shape
    Cout = w.shape[-1]
    if pool:
        assert H % 2 == 0 and W % 2 == 0, "pooled layers need even spatial dims"

    TH = _pick_row_tile(H, W, Cin, Cout, need_even=pool)
    n_row = H // TH
    Wp2 = W + 2

    # 1-pixel spatial zero pad in HBM.
    # TODO(synk): fold this pad away by writing the previous layer's output
    # into a pre-padded buffer (offset out_spec) instead of a jnp.pad pass.
    xp = jnp.pad(x_nhwc.astype(jnp.bfloat16), ((0, 0), (1, 1), (1, 1), (0, 0)))
    wb = w.reshape(3, 3 * Cin, Cout).astype(jnp.bfloat16)   # kx folded into K
    b2 = b.reshape(1, Cout).astype(jnp.float32)

    body_spec = pl.BlockSpec((1, TH, Wp2, Cin), lambda n, t: (n, t, 0, 0))
    halo0_spec = pl.BlockSpec((1, 1, Wp2, Cin), lambda n, t: (n, t * TH + TH, 0, 0))
    halo1_spec = pl.BlockSpec((1, 1, Wp2, Cin), lambda n, t: (n, t * TH + TH + 1, 0, 0))
    w_spec = pl.BlockSpec((3, 3 * Cin, Cout), lambda n, t: (0, 0, 0))
    b_spec = pl.BlockSpec((1, Cout), lambda n, t: (0, 0))
    o_spec = pl.BlockSpec((1, TH, W, Cout), lambda n, t: (n, t, 0, 0))

    out_shape = jax.ShapeDtypeStruct((N, H, W, Cout), jnp.bfloat16)
    out_specs = o_spec
    kernel = _conv3x3_relu_kernel
    if pool:
        p_spec = pl.BlockSpec((1, TH // 2, W // 2, Cout), lambda n, t: (n, t, 0, 0))
        out_shape = (out_shape,
                     jax.ShapeDtypeStruct((N, H // 2, W // 2, Cout), jnp.bfloat16))
        out_specs = (o_spec, p_spec)
        kernel = _conv3x3_relu_pool_kernel

    return pl.pallas_call(
        kernel,
        out_shape=out_shape,
        grid=(N, n_row),
        in_specs=[body_spec, halo0_spec, halo1_spec, w_spec, b_spec],
        out_specs=out_specs,
        compiler_params=pltpu.CompilerParams(
            dimension_semantics=("parallel", "parallel"),
            vmem_limit_bytes=48 * 1024 * 1024),
    )(xp, xp, xp, wb, b2)


# ----------------------------------------------------------------------------
# VGG16 forward (matches the PyTorch module's forward semantics)
# ----------------------------------------------------------------------------
_LAYER_CFG = [
    ("conv1_1", 3, 64), ("conv1_2", 64, 64),
    ("conv2_1", 64, 128), ("conv2_2", 128, 128),
    ("conv3_1", 128, 256), ("conv3_2", 256, 256), ("conv3_3", 256, 256),
    ("conv4_1", 256, 512), ("conv4_2", 512, 512), ("conv4_3", 512, 512),
]


def init_params(key):
    params = {}
    for i, (name, cin, cout) in enumerate(_LAYER_CFG):
        kw, kb = jax.random.split(jax.random.fold_in(key, i))
        scale = (9.0 * cin) ** -0.5
        w = jax.random.normal(kw, (3, 3, cin, cout), jnp.float32) * scale
        b = jax.random.normal(kb, (cout,), jnp.float32) * 0.01
        params[name] = (w, b)
    return params


def _forward(x_nchw, params, conv_fn):
    h = jnp.transpose(x_nchw, (0, 2, 3, 1))            # NCHW -> NHWC
    h = conv_fn(h, *params["conv1_1"])
    relu1_2, h = conv_fn(h, *params["conv1_2"], pool=True)
    h = conv_fn(h, *params["conv2_1"])
    relu2_2, h = conv_fn(h, *params["conv2_2"], pool=True)
    h = conv_fn(h, *params["conv3_1"])
    h = conv_fn(h, *params["conv3_2"])
    relu3_3, h = conv_fn(h, *params["conv3_3"], pool=True)
    h = conv_fn(h, *params["conv4_1"])
    h = conv_fn(h, *params["conv4_2"])
    relu4_3 = conv_fn(h, *params["conv4_3"])
    return [jnp.transpose(o, (0, 3, 1, 2)).astype(jnp.float32)   # NHWC -> NCHW
            for o in (relu1_2, relu2_2, relu3_3, relu4_3)]


def vgg16_forward(x_nchw, params):
    return _forward(x_nchw, params, conv3x3_relu)


# ----------------------------------------------------------------------------
# Pure-XLA reference for sanity checking.  It uses the same bf16-activation /
# f32-accumulation numerics as the kernels so the comparison isolates tiling /
# halo / indexing / pool-fusion correctness (not full f32 accuracy).
# ----------------------------------------------------------------------------
def _conv_ref(x_nhwc, w, b, *, pool=False):
    y = jax.lax.conv_general_dilated(
        x_nhwc.astype(jnp.bfloat16), w.astype(jnp.bfloat16),
        window_strides=(1, 1), padding="SAME",
        dimension_numbers=("NHWC", "HWIO", "NHWC"),
        preferred_element_type=jnp.float32)
    y = jnp.maximum(y + b.astype(jnp.float32), 0.0).astype(jnp.bfloat16)
    if pool:
        N, H, W, C = y.shape
        p = jnp.max(y.reshape(N, H // 2, 2, W // 2, 2, C), axis=(2, 4))
        return y, p
    return y


def vgg16_reference(x_nchw, params):
    return _forward(x_nchw, params, _conv_ref)


# ----------------------------------------------------------------------------
if __name__ == "__main__":
    key = jax.random.PRNGKey(0)
    x = jax.random.normal(jax.random.fold_in(key, 1234), (2, 3, 16, 16),
                          dtype=jnp.float32)
    params = init_params(key)

    outs = jax.block_until_ready(vgg16_forward(x, params))
    refs = jax.block_until_ready(vgg16_reference(x, params))

    for o, r in zip(outs, refs):
        assert o.shape == r.shape and o.dtype == r.dtype
        np.testing.assert_allclose(np.asarray(o), np.asarray(r),
                                   rtol=2e-2, atol=2e-2)

    print("KERNEL_OK")
</pallas_src>

<mosaic_0001>
module attributes {stable_mosaic.version = 11 : i64} {
  func.func @_conv3x3_relu_kernel(%arg0: i32, %arg1: i32, %arg2: memref<1x16x18x3xbf16, #tpu.memory_space<vmem>>, %arg3: memref<1x1x18x3xbf16, #tpu.memory_space<vmem>>, %arg4: memref<1x1x18x3xbf16, #tpu.memory_space<vmem>>, %arg5: memref<3x9x64xbf16, #tpu.memory_space<vmem>>, %arg6: memref<1x64xf32, #tpu.memory_space<vmem>>, %arg7: memref<1x16x16x64xbf16, #tpu.memory_space<vmem>>) attributes {dimension_semantics = [#tpu.dimension_semantics<parallel>, #tpu.dimension_semantics<parallel>], iteration_bounds = array<i64: 2, 1>, scalar_prefetch = 0 : i64, scratch_operands = 0 : i64, tpu.core_type = #tpu.core_type<tc>, window_params = [{transform_indices = @transform_0, window_bounds = array<i64: 1, 16, 18, 3>}, {transform_indices = @transform_1, window_bounds = array<i64: 1, 1, 18, 3>}, {transform_indices = @transform_2, window_bounds = array<i64: 1, 1, 18, 3>}, {pipeline_mode = #tpu.pipeline_mode<synchronous>, transform_indices = @transform_3, window_bounds = array<i64: 3, 9, 64>}, {pipeline_mode = #tpu.pipeline_mode<synchronous>, transform_indices = @transform_4, window_bounds = array<i64: 1, 64>}, {transform_indices = @transform_5, window_bounds = array<i64: 1, 16, 16, 64>}]} {
    %c0 = arith.constant 0 : index
    %c0_0 = arith.constant 0 : index
    %c0_1 = arith.constant 0 : index
    %c0_2 = arith.constant 0 : index
    %0 = vector.load %arg2[%c0, %c0_0, %c0_1, %c0_2] : memref<1x16x18x3xbf16, #tpu.memory_space<vmem>>, vector<1x16x18x3xbf16>
    %1 = vector.shape_cast %0 : vector<1x16x18x3xbf16> to vector<16x18x3xbf16>
    %c0_3 = arith.constant 0 : index
    %c0_4 = arith.constant 0 : index
    %c0_5 = arith.constant 0 : index
    %c0_6 = arith.constant 0 : index
    %2 = vector.load %arg3[%c0_3, %c0_4, %c0_5, %c0_6] : memref<1x1x18x3xbf16, #tpu.memory_space<vmem>>, vector<1x1x18x3xbf16>
    %3 = vector.shape_cast %2 : vector<1x1x18x3xbf16> to vector<1x18x3xbf16>
    %c0_7 = arith.constant 0 : index
    %c0_8 = arith.constant 0 : index
    %c0_9 = arith.constant 0 : index
    %c0_10 = arith.constant 0 : index
    %4 = vector.load %arg4[%c0_7, %c0_8, %c0_9, %c0_10] : memref<1x1x18x3xbf16, #tpu.memory_space<vmem>>, vector<1x1x18x3xbf16>
    %5 = vector.shape_cast %4 : vector<1x1x18x3xbf16> to vector<1x18x3xbf16>
    %6 = tpu.concatenate %1, %3, %5 in 0 : vector<16x18x3xbf16>, vector<1x18x3xbf16>, vector<1x18x3xbf16> -> vector<18x18x3xbf16>
    %c0_11 = arith.constant 0 : index
    %c0_12 = arith.constant 0 : index
    %7 = vector.load %arg6[%c0_11, %c0_12] : memref<1x64xf32, #tpu.memory_space<vmem>>, vector<1x64xf32>
    %8 = vector.shape_cast %7 : vector<1x64xf32> to vector<1x64xf32>
    %9 = vector.broadcast %8 : vector<1x64xf32> to vector<256x64xf32>
    %10 = vector.extract_strided_slice %6 {offsets = [0, 0, 0], sizes = [16, 18, 3], strides = [1, 1, 1]} : vector<18x18x3xbf16> to vector<16x18x3xbf16>
    %11 = vector.extract_strided_slice %10 {offsets = [0, 0, 0], sizes = [16, 16, 3], strides = [1, 1, 1]} : vector<16x18x3xbf16> to vector<16x16x3xbf16>
    %12 = vector.extract_strided_slice %10 {offsets = [0, 1, 0], sizes = [16, 16, 3], strides = [1, 1, 1]} : vector<16x18x3xbf16> to vector<16x16x3xbf16>
    %13 = vector.extract_strided_slice %10 {offsets = [0, 2, 0], sizes = [16, 16, 3], strides = [1, 1, 1]} : vector<16x18x3xbf16> to vector<16x16x3xbf16>
    %14 = tpu.concatenate %11, %12, %13 in 2 : vector<16x16x3xbf16>, vector<16x16x3xbf16>, vector<16x16x3xbf16> -> vector<16x16x9xbf16>
    %15 = vector.shape_cast %14 : vector<16x16x9xbf16> to vector<256x9xbf16>
    %c0_13 = arith.constant 0 : index
    %c0_14 = arith.constant 0 : index
    %c0_15 = arith.constant 0 : index
    %16 = vector.load %arg5[%c0_13, %c0_14, %c0_15] : memref<3x9x64xbf16, #tpu.memory_space<vmem>>, vector<1x9x64xbf16>
    %17 = vector.shape_cast %16 : vector<1x9x64xbf16> to vector<9x64xbf16>
    %cst = arith.constant dense<0.000000e+00> : vector<256x64xf32>
    %18 = tpu.matmul %15, %17, %cst {dimension_numbers = #tpu.dot_dimension_numbers<[1], [0], [0], [1], [0, 0, 1, 1], [], []>} : vector<256x9xbf16>, vector<9x64xbf16>, vector<256x64xf32> -> vector<256x64xf32>
    %19 = arith.addf %9, %18 : vector<256x64xf32>
    %20 = vector.extract_strided_slice %6 {offsets = [1, 0, 0], sizes = [16, 18, 3], strides = [1, 1, 1]} : vector<18x18x3xbf16> to vector<16x18x3xbf16>
    %21 = vector.extract_strided_slice %20 {offsets = [0, 0, 0], sizes = [16, 16, 3], strides = [1, 1, 1]} : vector<16x18x3xbf16> to vector<16x16x3xbf16>
    %22 = vector.extract_strided_slice %20 {offsets = [0, 1, 0], sizes = [16, 16, 3], strides = [1, 1, 1]} : vector<16x18x3xbf16> to vector<16x16x3xbf16>
    %23 = vector.extract_strided_slice %20 {offsets = [0, 2, 0], sizes = [16, 16, 3], strides = [1, 1, 1]} : vector<16x18x3xbf16> to vector<16x16x3xbf16>
    %24 = tpu.concatenate %21, %22, %23 in 2 : vector<16x16x3xbf16>, vector<16x16x3xbf16>, vector<16x16x3xbf16> -> vector<16x16x9xbf16>
    %25 = vector.shape_cast %24 : vector<16x16x9xbf16> to vector<256x9xbf16>
    %c1 = arith.constant 1 : index
    %c0_16 = arith.constant 0 : index
    %c0_17 = arith.constant 0 : index
    %26 = vector.load %arg5[%c1, %c0_16, %c0_17] : memref<3x9x64xbf16, #tpu.memory_space<vmem>>, vector<1x9x64xbf16>
    %27 = vector.shape_cast %26 : vector<1x9x64xbf16> to vector<9x64xbf16>
    %cst_18 = arith.constant dense<0.000000e+00> : vector<256x64xf32>
    %28 = tpu.matmul %25, %27, %cst_18 {dimension_numbers = #tpu.dot_dimension_numbers<[1], [0], [0], [1], [0, 0, 1, 1], [], []>} : vector<256x9xbf16>, vector<9x64xbf16>, vector<256x64xf32> -> vector<256x64xf32>
    %29 = arith.addf %19, %28 : vector<256x64xf32>
    %30 = vector.extract_strided_slice %6 {offsets = [2, 0, 0], sizes = [16, 18, 3], strides = [1, 1, 1]} : vector<18x18x3xbf16> to vector<16x18x3xbf16>
    %31 = vector.extract_strided_slice %30 {offsets = [0, 0, 0], sizes = [16, 16, 3], strides = [1, 1, 1]} : vector<16x18x3xbf16> to vector<16x16x3xbf16>
    %32 = vector.extract_strided_slice %30 {offsets = [0, 1, 0], sizes = [16, 16, 3], strides = [1, 1, 1]} : vector<16x18x3xbf16> to vector<16x16x3xbf16>
    %33 = vector.extract_strided_slice %30 {offsets = [0, 2, 0], sizes = [16, 16, 3], strides = [1, 1, 1]} : vector<16x18x3xbf16> to vector<16x16x3xbf16>
    %34 = tpu.concatenate %31, %32, %33 in 2 : vector<16x16x3xbf16>, vector<16x16x3xbf16>, vector<16x16x3xbf16> -> vector<16x16x9xbf16>
    %35 = vector.shape_cast %34 : vector<16x16x9xbf16> to vector<256x9xbf16>
    %c2 = arith.constant 2 : index
    %c0_19 = arith.constant 0 : index
    %c0_20 = arith.constant 0 : index
    %36 = vector.load %arg5[%c2, %c0_19, %c0_20] : memref<3x9x64xbf16, #tpu.memory_space<vmem>>, vector<1x9x64xbf16>
    %37 = vector.shape_cast %36 : vector<1x9x64xbf16> to vector<9x64xbf16>
    %cst_21 = arith.constant dense<0.000000e+00> : vector<256x64xf32>
    %38 = tpu.matmul %35, %37, %cst_21 {dimension_numbers = #tpu.dot_dimension_numbers<[1], [0], [0], [1], [0, 0, 1, 1], [], []>} : vector<256x9xbf16>, vector<9x64xbf16>, vector<256x64xf32> -> vector<256x64xf32>
    %39 = arith.addf %29, %38 : vector<256x64xf32>
    %cst_22 = arith.constant 0.000000e+00 : f32
    %40 = vector.broadcast %cst_22 : f32 to vector<256x64xf32>
    %41 = arith.maximumf %39, %40 : vector<256x64xf32>
    %42 = vector.shape_cast %41 : vector<256x64xf32> to vector<16x16x64xf32>
    %43 = arith.truncf %42 : vector<16x16x64xf32> to vector<16x16x64xbf16>
    %c0_23 = arith.constant 0 : index
    %c0_24 = arith.constant 0 : index
    %c0_25 = arith.constant 0 : index
    %c0_26 = arith.constant 0 : index
    %44 = vector.load %arg7[%c0_23, %c0_24, %c0_25, %c0_26] : memref<1x16x16x64xbf16, #tpu.memory_space<vmem>>, vector<1x16x16x64xbf16>
    %45 = vector.shape_cast %44 : vector<1x16x16x64xbf16> to vector<16x16x64xbf16>
    %46 = vector.shape_cast %43 : vector<16x16x64xbf16> to vector<1x16x16x64xbf16>
    tpu.vector_store %arg7[%c0_23, %c0_24, %c0_25, %c0_26], %46 {strides = array<i32>} : memref<1x16x16x64xbf16, #tpu.memory_space<vmem>>, vector<1x16x16x64xbf16>,
    return
  }
  func.func @transform_0(%arg0: i32, %arg1: i32) -> (i32, i32, i32, i32) {
    %c0_i32 = arith.constant 0 : i32
    %c0_i32_0 = arith.constant 0 : i32
    %c0_i32_1 = arith.constant 0 : i32
    return %arg0, %arg1, %c0_i32, %c0_i32_0 : i32, i32, i32, i32
  }
  func.func @transform_1(%arg0: i32, %arg1: i32) -> (i32, i32, i32, i32) {
    %c16_i32 = arith.constant 16 : i32
    %0 = arith.muli %arg1, %c16_i32 : i32
    %c16_i32_0 = arith.constant 16 : i32
    %1 = arith.addi %0, %c16_i32_0 : i32
    %c0_i32 = arith.constant 0 : i32
    %c0_i32_1 = arith.constant 0 : i32
    %c0_i32_2 = arith.constant 0 : i32
    return %arg0, %1, %c0_i32, %c0_i32_1 : i32, i32, i32, i32
  }
  func.func @transform_2(%arg0: i32, %arg1: i32) -> (i32, i32, i32, i32) {
    %c16_i32 = arith.constant 16 : i32
    %0 = arith.muli %arg1, %c16_i32 : i32
    %c16_i32_0 = arith.constant 16 : i32
    %1 = arith.addi %0, %c16_i32_0 : i32
    %c1_i32 = arith.constant 1 : i32
    %2 = arith.addi %1, %c1_i32 : i32
    %c0_i32 = arith.constant 0 : i32
    %c0_i32_1 = arith.constant 0 : i32
    %c0_i32_2 = arith.constant 0 : i32
    return %arg0, %2, %c0_i32, %c0_i32_1 : i32, i32, i32, i32
  }
  func.func @transform_3(%arg0: i32, %arg1: i32) -> (i32, i32, i32) {
    %c0_i32 = arith.constant 0 : i32
    %c0_i32_0 = arith.constant 0 : i32
    %c0_i32_1 = arith.constant 0 : i32
    %c0_i32_2 = arith.constant 0 : i32
    return %c0_i32, %c0_i32_0, %c0_i32_1 : i32, i32, i32
  }
  func.func @transform_4(%arg0: i32, %arg1: i32) -> (i32, i32) {
    %c0_i32 = arith.constant 0 : i32
    %c0_i32_0 = arith.constant 0 : i32
    %c0_i32_1 = arith.constant 0 : i32
    return %c0_i32, %c0_i32_0 : i32, i32
  }
  func.func @transform_5(%arg0: i32, %arg1: i32) -> (i32, i32, i32, i32) {
    %c0_i32 = arith.constant 0 : i32
    %c0_i32_0 = arith.constant 0 : i32
    %c0_i32_1 = arith.constant 0 : i32
    return %arg0, %arg1, %c0_i32, %c0_i32_0 : i32, i32, i32, i32
  }
}

</mosaic_0001>

<bundles_post_ra>
// kernel: tpu_custom_call.1
= control target key start
LH: loop header
LB: loop body
LE: loop exit
PB: predicated region body
PF: predicated region fallthrough
CT: control target
= control target key end

     0   :  { %10 = vsyncpa [#allocation3], 0  ;;  %s3219_s0 = inlined_call_operand.vmem [shape: bf16[2,18,18,3], index: 0, kind: input, shape index: {}]   ;;  %s3220_s1 = inlined_call_operand.vmem [shape: bf16[2,18,18,3], index: 1, kind: input, shape index: {}]   ;;  %s3221_s2 = inlined_call_operand.vmem [shape: bf16[2,18,18,3], index: 2, kind: input, shape index: {}]   ;;  %s3222_s3 = inlined_call_operand.vmem [shape: bf16[3,9,64], index: 3, kind: input, shape index: {}]   ;;  %s3223_s4 = inlined_call_operand.vmem [shape: f32[1,64], index: 4, kind: input, shape index: {}]   ;;  %s3224_s5 = inlined_call_operand.hbm [shape: bf16[2,16,16,64], index: 5, kind: output, shape index: {}]  }
   0x1   :  { %12 = vsyncpa [#allocation3 + $0x1], 0  ;;  %s2632_s18 = smov 0   ;;  %s2634_s19 = smov 0  }
   0x2   :  { %s2636_s20 = smov 0   ;;  %s2638_s21 = smov 0  }
   0x3   :  { %s2640_s22 = smov 0   ;;  %s2642_s23 = smov 0  }
   0x4 LB: > { %s1988_s24 = sadd.s32 4294967295, %s2594_s23   ;;  %s1989_s25 = sadd.s32 4294967294, %s2594_s23   ;;  %s2594_s23 = sphi %s2642_s23, %s18_s23   ;;  %s2590_s22 = sphi %s2640_s22, %s3231_s22   ;;  %s2586_s21 = sphi %s2638_s21, %s3230_s21   ;;  %s2582_s20 = sphi %s2636_s20, %s3229_s20   ;;  %s2578_s19 = sphi %s2634_s19, %s3228_s19   ;;  %s2574_s18 = sphi %s2632_s18, %s3227_s18  }
   0x5   : > { %s30_s26 = sadd.s32 1, %s2590_s22  ;;  %s173_s27 = sadd.s32 1, %s2582_s20 }
   0x6   : > { %p32_p0 = scmp.ge.s32.totalorder %s30_s26, 2  ;;  %p183_p1 = scmp.ne.s32.totalorder %s2582_s20, %s2578_s19 }
   0x7   : > { %p184_p2 = scmp.eq.s32.totalorder %s1988_s24, 1  ;;  %p189_p3 = scmp.ne.s32.totalorder %s2578_s19, %s2574_s18 }
   0x8   : > { %s3233_s26 = smov (%p32_p0, %s30_s26), 0  ;;  %p190_p5 = scmp.eq.s32.totalorder %s1989_s25, 1 }
   0x9   : > { %p2672_p4 = por %p184_p2, %p183_p1  ;;  %s168_s29 = ssub.s32 %s2590_s22, %s3233_s26 }
   0xa   : > { %p1992_p6 = scmp.ge.s32.totalorder %s2594_s23, 1  ;;  %p171_p7 = scmp.eq.s32.totalorder %s168_s29, 0 }
   0xb   : > { %p2679_p8 = por %p190_p5, %p189_p3  ;;  %p270_p9 = scmp.lt.s32.totalorder %s2594_s23, 3 }
   0xc   : > { %s2685_s6 = scalar_select %p171_p7, %s2582_s20, %s173_s27  }
   0xd   : > { %p271_p10 = pnand %p1992_p6, %p270_p9 }
   0xe   : > { %p336_p11 = scmp.lt.s32.totalorder (!%p271_p10), %s2586_s21, 1  ;;  %vm980_vm0 = vcmask (!%p271_p10), 1043456   ;;  %v2513_v0 = vld [vmem:[%s3222_s3] sm:$0x1f] (!%p271_p10)   ;;  %vm981_vm1 = vcmask (!%p271_p10), 1044480   ;;  %v2596_v1 = vmov (!%p271_p10), 65535  }
   0xf   : > { %274 = sbr.rel (%p271_p10) target bundleno = 484 (0x1e4), region = 40  ;;  %v982_v2 = vsel (!%p271_p10), %vm980_vm0, 4294967295, %v2596_v1  ;;  %v2514_v4 = vld [vmem:[%s3222_s3 + $0x8] sm:$0x1f] (!%p271_p10)   ;;  %vm793_vm2 = vcmask (!%p271_p10), 1046528   ;;  %s2597_s16 = smov (!%p271_p10), 6  }
  0x10   : > { %v2694_v3 = vsel (!%p271_p10), %vm981_vm1, %v982_v2, 0  ;;  %vm568_vm3 = vsmask.f32 (!%p271_p10), 7424  ;;  %s2598_s17 = smov (!%p271_p10), 3   ;;  %vm874_vm4 = vcmask (!%p271_p10), 23552   ;;  %vm907_vm5 = vcmask (!%p271_p10), 48128  }
  0x11   : > { %v985_v5 = vand.u32 (!%p271_p10), %v2513_v0, %v2694_v3  ;;  %v2707_v6 = vand.u32 (!%p271_p10), %v2514_v4, %v2694_v3  ;;  %vm947_vm6 = vcmask (!%p271_p10), 72704   ;;  %vm1814_vm7 = vcmask (!%p271_p10), 519168   ;;  %s2599_s9 = smov (!%p271_p10), [#allocation2]  }
  0x13   : > { %2214 = vmatprep.subr.bf16.mxu1 (!%p271_p10), %v985_v5  ;;  %2248 = vmatprep.subr.bf16.mxu0 (!%p271_p10), %v2707_v6 }
  0x14   : > { %2215 = vmatpush3.bf16.msra.mxu1 (!%p271_p10), %v985_v5  ;;  %2249 = vmatpush3.bf16.msra.mxu0 (!%p271_p10), %v2707_v6 }
  0x15   : > { %2316 = vmatprep.subr.bf16.mxu1 (!%p271_p10), %v2707_v6 }
  0x16   : > { %s337_s7 = scalar_select %p336_p11, %s2586_s21, 1 }
  0x18   : > { %s2692_s10 = smul.u32 216, %s337_s7 }
  0x1a   : > { %s2704_s15 = scalar_lea.vmem %s3219_s0, %s2692_s10  ;;  %s2127_s24 = sadd.s32 192, %s2692_s10 }
  0x1b   : > { %v2710_v7 = vld [vmem:[%s2704_s15] sm:$0xff]   ;;  %v2478_v8 = vld [vmem:[%s2704_s15 + $0x8] ss:$0 sps:$4 sm:$0x11]   ;;  %v2715_v9 = vld [vmem:[%s2704_s15 + $0xc] sm:$0xff]   ;;  %s2858_s29 = scalar_lea.vmem %s3220_s1, %s2127_s24  ;;  %s2129_s7 = sadd.s32 204, %s2692_s10 }
  0x1c   : > { %v794_v10 = vrot.slane %v2710_v7, 1  ;;  %v795_v11 = vrot.slane %v2478_v8, 1  ;;  %v570_v12 = vshrl.u32 %v2710_v7, 16  ;;  %v572_v13 = vshll.u32 %v2710_v7, 16  ;;  %v2729_v24 = vld [vmem:[%s2704_s15 + $0x18] sm:$0xff]   ;;  %v2736_v32 = vld [vmem:[%s2704_s15 + $0x24] sm:$0xff]   ;;  %s2877_s10 = scalar_lea.vmem %s3221_s2, %s2129_s7 }
  0x1d   : > { %v577_v14 = vshll.u32 %v2478_v8, 16  ;;  %v2480_v15 = vld [vmem:[%s2704_s15 + $0x14] ss:$0 sps:$4 sm:$0x11]   ;;  %v797_v16 = vrot.slane %v2715_v9, 1  ;;  %v582_v17 = vshrl.u32 %v2715_v9, 16 }
  0x1e   : > { %v796_v18 = vsel %vm793_vm2, %v794_v10, %v795_v11  ;;  %v574_v19 = vrot.slane %v572_v13, 1  ;;  %v584_v20 = vshll.u32 %v2715_v9, 16  ;;  %v798_v22 = vrot.slane %v2480_v15, 1  ;;  %v2482_v27 = vld [vmem:[%s2704_s15 + $0x20] ss:$0 sps:$4 sm:$0x11]  }
  0x1f   : > { %842 = vrot.lane.b32.xlu1 %v796_v18, %s2597_s16  ;;  %v579_v21 = vrot.slane %v577_v14, 1  ;;  %v589_v23 = vshll.u32 %v2480_v15, 16  ;;  %v800_v30 = vrot.slane %v2729_v24, 1  ;;  %v594_v31 = vshrl.u32 %v2729_v24, 16  ;;  %v2742_v38 = vld [vmem:[%s2704_s15 + $0x30] sm:$0xff]   ;;  %v2758_v57 = vld [vmem:[%s2704_s15 + $0x3c] sm:$0xff]  }
  0x20   : > { %v575_v25 = vor.u32 %v574_v19, %v570_v12  ;;  %v586_v26 = vrot.slane %v584_v20, 1  ;;  %v799_v28 = vsel %vm793_vm2, %v797_v16, %v798_v22  ;;  %v801_v35 = vrot.slane %v2482_v27, 1  ;;  %v2484_v37 = vld [vmem:[%s2704_s15 + $0x2c] ss:$0 sps:$4 sm:$0x11]   ;;  %v2772_v12 = vld [vmem:[%s2704_s15 + $0x54] sm:$0xff]  }
  0x21   : > { %v591_v29 = vrot.slane %v589_v23, 1  ;;  %v596_v36 = vshll.u32 %v2729_v24, 16  ;;  %v601_v39 = vshll.u32 %v2482_v27, 16  ;;  %v803_v40 = vrot.slane %v2736_v32, 1  ;;  %v2766_v4 = vld [vmem:[%s2704_s15 + $0x48] sm:$0xff]   ;;  %s2162_s24 = sshll.u32 %s2586_s21, 11 }
  0x22   : > { %v580_v33 = vsel %vm568_vm3, %v575_v25, %v579_v21  ;;  %v587_v34 = vor.u32 %v586_v26, %v582_v17  ;;  %v606_v41 = vshrl.u32 %v2736_v32, 16  ;;  %v608_v42 = vshll.u32 %v2736_v32, 16  ;;  %v2486_v50 = vld [vmem:[%s2704_s15 + $0x38] ss:$0 sps:$4 sm:$0x11]   ;;  %s3161_s7 = scalar_lea.hbm %s3224_s5, %s2162_s24 }
  0x23   : > { %761 = vrot.lane.b32.xlu0 %v580_v33, %s2598_s17  ;;  %844 = vrot.lane.b32.xlu1 %v799_v28, %s2597_s16  ;;  %v802_v44 = vsel %vm793_vm2, %v800_v30, %v801_v35  ;;  %v598_v45 = vrot.slane %v596_v36, 1  ;;  %v804_v46 = vrot.slane %v2484_v37, 1  ;;  %v603_v47 = vrot.slane %v601_v39, 1  ;;  %v2488_v62 = vld [vmem:[%s2704_s15 + $0x44] ss:$0 sps:$4 sm:$0x11]  }
  0x24   : > { %v592_v43 = vsel %vm568_vm3, %v587_v34, %v591_v29  ;;  %v610_v48 = vrot.slane %v608_v42, 1  ;;  %v613_v49 = vshll.u32 %v2484_v37, 16  ;;  %v806_v52 = vrot.slane %v2742_v38, 1  ;;  %v2490_v16 = vld [vmem:[%s2704_s15 + $0x50] ss:$0 sps:$4 sm:$0x11]  }
  0x25   : > { %v599_v51 = vor.u32 %v598_v45, %v594_v31  ;;  %v618_v53 = vshrl.u32 %v2742_v38, 16  ;;  %v807_v55 = vrot.slane %v2486_v50, 1  ;;  %v620_v56 = vshll.u32 %v2742_v38, 16  ;;  %v2492_v20 = vld [vmem:[%s2704_s15 + $0x5c] ss:$0 sps:$4 sm:$0x11]  }
  0x26   : > { %v615_v54 = vrot.slane %v613_v49, 1  ;;  %v805_v59 = vsel %vm793_vm2, %v803_v40, %v804_v46  ;;  %v611_v60 = vor.u32 %v610_v48, %v606_v41  ;;  %v625_v61 = vshll.u32 %v2486_v50, 16  ;;  %v2787_v30 = vld [vmem:[%s2704_s15 + $0x60] sm:$0xff]   ;;  %v2792_v34 = vld [vmem:[%s2704_s15 + $0x6c] sm:$0xff]  }
  0x27   : > { %763 = vrot.lane.b32.xlu0 %v592_v43, %s2598_s17  ;;  %846 = vrot.lane.b32.xlu1 %v802_v44, %s2597_s16  ;;  %v604_v58 = vsel %vm568_vm3, %v599_v51, %v603_v47  ;;  %v622_v63 = vrot.slane %v620_v56, 1  ;;  %v809_v1 = vrot.slane %v2758_v57, 1  ;;  %v632_v2 = vshll.u32 %v2758_v57, 16  ;;  %v2494_v36 = vld [vmem:[%s2704_s15 + $0x68] ss:$0 sps:$4 sm:$0x11]  }
  0x28   : > { %v627_v0 = vrot.slane %v625_v61, 1  ;;  %v810_v8 = vrot.slane %v2488_v62, 1  ;;  %v630_v10 = vshrl.u32 %v2758_v57, 16  ;;  %v637_v11 = vshll.u32 %v2488_v62, 16  ;;  %v2796_v37 = vld [vmem:[%s2704_s15 + $0x84] sm:$0xff]   ;;  %v2815_v61 = vld [vmem:[%s2704_s15 + $0x78] sm:$0xff]  }
  0x29   : > { %v623_v5 = vor.u32 %v622_v63, %v618_v53  ;;  %v616_v13 = vsel %vm568_vm3, %v611_v60, %v615_v54  ;;  %v808_v14 = vsel %vm793_vm2, %v806_v52, %v807_v55  ;;  %v634_v15 = vrot.slane %v632_v2, 1  ;;  %v2496_v46 = vld [vmem:[%s2704_s15 + $0x74] ss:$0 sps:$4 sm:$0x11]  }
  0x2a   : > { %v644_v17 = vshll.u32 %v2766_v4, 16  ;;  %v812_v18 = vrot.slane %v2766_v4, 1  ;;  %v642_v19 = vshrl.u32 %v2766_v4, 16  ;;  %v811_v22 = vsel %vm793_vm2, %v809_v1, %v810_v8  ;;  %v2498_v51 = vld [vmem:[%s2704_s15 + $0x8c] ss:$0 sps:$4 sm:$0x11]  }
  0x2b   : > { %765 = vrot.lane.b32.xlu0 %v604_v58, %s2598_s17  ;;  %848 = vrot.lane.b32.xlu1 %v805_v59, %s2597_s16  ;;  %v628_v21 = vsel %vm568_vm3, %v623_v5, %v627_v0  ;;  %v813_v23 = vrot.slane %v2490_v16, 1  ;;  %v656_v25 = vshll.u32 %v2772_v12, 16  ;;  %v635_v26 = vor.u32 %v634_v15, %v630_v10  ;;  %v2820_v5 = vld [vmem:[%s2704_s15 + $0x80] ss:$0 sps:$4 sm:$0x11]  }
  0x2c   : > { %v639_v27 = vrot.slane %v637_v11, 1  ;;  %v646_v28 = vrot.slane %v644_v17, 1  ;;  %v649_v29 = vshll.u32 %v2490_v16, 16  ;;  %v815_v31 = vrot.slane %v2772_v12, 1  ;;  %v2828_v17 = vld [vmem:[%s2704_s15 + $0x9c] sm:$0xff]  }
  0x2d   : > { %v654_v33 = vshrl.u32 %v2772_v12, 16  ;;  %v661_v35 = vshll.u32 %v2492_v20, 16  ;;  %v814_v39 = vsel %vm793_vm2, %v812_v18, %v813_v23  ;;  %v816_v40 = vrot.slane %v2492_v20, 1 }
  0x2e   : > { %v658_v41 = vrot.slane %v656_v25, 1  ;;  %v640_v42 = vsel %vm568_vm3, %v635_v26, %v639_v27  ;;  %v647_v43 = vor.u32 %v646_v28, %v642_v19  ;;  %v651_v44 = vrot.slane %v649_v29, 1  ;;  %v2835_v26 = vld [vmem:[%s2704_s15 + $0x90] sm:$0xff]   ;;  %v2502_v29 = vld [vmem:[%s2704_s15 + $0xa4] ss:$0 sps:$4 sm:$0x11]  }
  0x2f   : > { %767 = vrot.lane.b32.xlu0 %v616_v13, %s2598_s17  ;;  %850 = vrot.lane.b32.xlu1 %v808_v14, %s2597_s16  ;;  %v668_v45 = vshll.u32 %v2787_v30, 16  ;;  %v680_v47 = vshll.u32 %v2792_v34, 16  ;;  %v663_v48 = vrot.slane %v661_v35, 1  ;;  %v818_v49 = vrot.slane %v2787_v30, 1 }
  0x30   : > { %v666_v50 = vshrl.u32 %v2787_v30, 16  ;;  %v817_v52 = vsel %vm793_vm2, %v815_v31, %v816_v40  ;;  %v659_v53 = vor.u32 %v658_v41, %v654_v33  ;;  %v819_v54 = vrot.slane %v2494_v36, 1 }
  0x31   : > { %v704_v55 = vshll.u32 %v2796_v37, 16  ;;  %v652_v56 = vsel %vm568_vm3, %v647_v43, %v651_v44  ;;  %v670_v58 = vrot.slane %v668_v45, 1  ;;  %v673_v59 = vshll.u32 %v2494_v36, 16  ;;  %v2844_v36 = vld [vmem:[%s2704_s15 + $0x98] ss:$0 sps:$4 sm:$0x11]  }
  0x32   : > { %v821_v60 = vrot.slane %v2792_v34, 1  ;;  %v678_v62 = vshrl.u32 %v2792_v34, 16  ;;  %v682_v63 = vrot.slane %v680_v47, 1  ;;  %v685_v0 = vshll.u32 %v2496_v46, 16  ;;  %v2853_v47 = vld [vmem:[%s2704_s15 + $0xb4] sm:$0xff]  }
  0x33   : > { %769 = vrot.lane.b32.xlu0 %v628_v21, %s2598_s17  ;;  %852 = vrot.lane.b32.xlu1 %v811_v22, %s2597_s16  ;;  %v702_v1 = vshrl.u32 %v2796_v37, 16  ;;  %v709_v2 = vshll.u32 %v2498_v51, 16  ;;  %v664_v8 = vsel %vm568_vm3, %v659_v53, %v663_v48  ;;  %v706_v10 = vrot.slane %v704_v55, 1 }
  0x34   : > { %v692_v11 = vshll.u32 %v2815_v61, 16  ;;  %v820_v13 = vsel %vm793_vm2, %v818_v49, %v819_v54  ;;  %v671_v14 = vor.u32 %v670_v58, %v666_v50  ;;  %v675_v15 = vrot.slane %v673_v59, 1  ;;  %v2506_v58 = vld [vmem:[%s2704_s15 + $0xbc] ss:$0 sps:$4 sm:$0x11]  }
  0x35   : > { %v822_v16 = vrot.slane %v2496_v46, 1  ;;  %v683_v18 = vor.u32 %v682_v63, %v678_v62  ;;  %v687_v19 = vrot.slane %v685_v0, 1  ;;  %v711_v20 = vrot.slane %v709_v2, 1 }
  0x36   : > { %v707_v21 = vor.u32 %v706_v10, %v702_v1  ;;  %v690_v22 = vshrl.u32 %v2815_v61, 16  ;;  %v694_v23 = vrot.slane %v692_v11, 1  ;;  %v697_v25 = vshll.u32 %v2820_v5, 16 }
  0x37   : > { %771 = vrot.lane.b32.xlu0 %v640_v42, %s2598_s17  ;;  %854 = vrot.lane.b32.xlu1 %v814_v39, %s2597_s16  ;;  %v676_v27 = vsel %vm568_vm3, %v671_v14, %v675_v15  ;;  %v823_v28 = vsel %vm793_vm2, %v821_v60, %v822_v16  ;;  %v728_v31 = vshll.u32 %v2828_v17, 16  ;;  %v827_v33 = vrot.slane %v2796_v37, 1  ;;  %v2872_v60 = vld [vmem:[%s2704_s15 + $0xa8] sm:$0xff]   ;;  %v2515_v15 = vld [vmem:[%s3222_s3 + $0x10] sm:$0x1f]  }
  0x38   : > { %v828_v35 = vrot.slane %v2498_v51, 1  ;;  %v688_v39 = vsel %vm568_vm3, %v683_v18, %v687_v19  ;;  %v712_v40 = vsel %vm568_vm3, %v707_v21, %v711_v20  ;;  %v726_v41 = vshrl.u32 %v2828_v17, 16 }
  0x39   : > { %v716_v42 = vshll.u32 %v2835_v26, 16  ;;  %v695_v43 = vor.u32 %v694_v23, %v690_v22  ;;  %v699_v44 = vrot.slane %v697_v25, 1  ;;  %v730_v45 = vrot.slane %v728_v31, 1  ;;  %v2901_v23 = vld [vmem:[%s2858_s29] sm:$0xff]  }
  0x3a   : > { %v733_v46 = vshll.u32 %v2502_v29, 16  ;;  %v829_v48 = vsel %vm793_vm2, %v827_v33, %v828_v35  ;;  %v824_v49 = vrot.slane %v2815_v61, 1  ;;  %v825_v50 = vrot.slane %v2820_v5, 1  ;;  %v2510_v33 = vld [vmem:[%s2858_s29 + $0x8] ss:$0 sps:$4 sm:$0x11]  }
  0x3b   : > { %773 = vrot.lane.b32.xlu0 %v652_v56, %s2598_s17  ;;  %856 = vrot.lane.b32.xlu1 %v817_v52, %s2597_s16  ;;  %v714_v51 = vshrl.u32 %v2835_v26, 16  ;;  %v718_v52 = vrot.slane %v716_v42, 1  ;;  %v721_v53 = vshll.u32 %v2844_v36, 16  ;;  %v700_v54 = vsel %vm568_vm3, %v695_v43, %v699_v44  ;;  %v2912_v42 = vld [vmem:[%s2877_s10] sm:$0xff]  }
  0x3c   : > { %v731_v55 = vor.u32 %v730_v45, %v726_v41  ;;  %v735_v56 = vrot.slane %v733_v46, 1  ;;  %v752_v59 = vshll.u32 %v2853_v47, 16  ;;  %v833_v62 = vrot.slane %v2828_v17, 1 }
  0x3d   : > { %v834_v63 = vrot.slane %v2502_v29, 1  ;;  %v826_v0 = vsel %vm793_vm2, %v824_v49, %v825_v50  ;;  %v719_v1 = vor.u32 %v718_v52, %v714_v51  ;;  %v723_v2 = vrot.slane %v721_v53, 1  ;;  %v2512_v53 = vld [vmem:[%s2877_s10 + $0x8] ss:$0 sps:$4 sm:$0x11]   ;;  %s2520_s10 = sshll.u32 %s2599_s9, 4  ;;  %s2521_s10 = int_to_ptr.vmem [resolvable:$false] %s2520_s10 }
  0x3e   : > { %v750_v5 = vshrl.u32 %v2853_v47, 16  ;;  %v736_v10 = vsel %vm568_vm3, %v731_v55, %v735_v56  ;;  %v754_v11 = vrot.slane %v752_v59, 1  ;;  %v740_v14 = vshll.u32 %v2872_v60, 16  ;;  %s2522_s11 = scalar_lea.vmem %s2521_s10, 4096 }
  0x3f   : > { %775 = vrot.lane.b32.xlu0 %v664_v8, %s2598_s17  ;;  %858 = vrot.lane.b32.xlu1 %v820_v13, %s2597_s16  ;;  %v2508_v8 = vld [vmem:[%s2704_s15 + $0xb0] ss:$0 sps:$4 sm:$0x11]   ;;  %v757_v13 = vshll.u32 %v2506_v58, 16  ;;  %v835_v16 = vsel %vm793_vm2, %v833_v62, %v834_v63  ;;  %v2892_v18 = vand.u32 %v2515_v15, %v2694_v3  ;;  %v724_v19 = vsel %vm568_vm3, %v719_v1, %v723_v2  ;;  %s327_s15 = sand.u32 1, %s2578_s19  }
  0x40   : > { %v830_v20 = vrot.slane %v2835_v26, 1  ;;  %v831_v21 = vrot.slane %v2844_v36, 1  ;;  %v738_v22 = vshrl.u32 %v2872_v60, 16  ;;  %v755_v25 = vor.u32 %v754_v11, %v750_v5  ;;  %s3173_s21 = scalar_lea.sflag [#allocation3], %s327_s15 }
  0x41   : > { %v742_v3 = vrot.slane %v740_v14, 1  ;;  %2282 = vmatprep.subr.bf16.mxu0 %v2892_v18  ;;  %v839_v29 = vrot.slane %v2853_v47, 1  ;;  %v840_v31 = vrot.slane %v2506_v58, 1  ;;  %v1191_v35 = vshll.u32 %v2901_v23, 16 }
  0x42   : > { %v832_v36 = vsel %vm793_vm2, %v830_v20, %v831_v21  ;;  %v836_v43 = vrot.slane %v2872_v60, 1  ;;  %v837_v44 = vrot.slane %v2508_v8, 1  ;;  %v1189_v46 = vshrl.u32 %v2901_v23, 16 }
  0x43   : > { %777 = vrot.lane.b32.xlu0 %v676_v27, %s2598_s17  ;;  %860 = vrot.lane.b32.xlu1 %v823_v28, %s2597_s16  ;;  %v759_v27 = vrot.slane %v757_v13, 1  ;;  %v745_v28 = vshll.u32 %v2508_v8, 16  ;;  %v841_v45 = vsel %vm793_vm2, %v839_v29, %v840_v31  ;;  %v1196_v49 = vshll.u32 %v2510_v33, 16 }
  0x44   : > { %v1202_v51 = vrot.slane %v2901_v23, 1  ;;  %v1203_v52 = vrot.slane %v2510_v33, 1  ;;  %v838_v55 = vsel %vm793_vm2, %v836_v43, %v837_v44  ;;  %v1426_v59 = vshrl.u32 %v2912_v42, 16 }
  0x45   : > { %v747_v41 = vrot.slane %v745_v28, 1  ;;  %v1198_v58 = vrot.slane %v1196_v49, 1  ;;  %v1439_v62 = vrot.slane %v2912_v42, 1  ;;  %v1433_v1 = vshll.u32 %v2512_v53, 16 }
  0x46   : > { %v1204_v63 = vsel %vm793_vm2, %v1202_v51, %v1203_v52  ;;  %v1440_v2 = vrot.slane %v2512_v53, 1 }
  0x47   : > { %779 = vrot.lane.b32.xlu0 %v688_v39, %s2598_s17  ;;  %783 = vrot.lane.b32.xlu1 %v712_v40, %s2598_s17  ;;  %v760_v39 = vsel %vm568_vm3, %v755_v25, %v759_v27  ;;  %v743_v40 = vor.u32 %v742_v3, %v738_v22 }
  0x48   : > { %v1441_v11 = vsel %vm793_vm2, %v1439_v62, %v1440_v2 }
  0x49   : > { %v748_v50 = vsel %vm568_vm3, %v743_v40, %v747_v41 }
  0x4b   : > { %781 = vrot.lane.b32.xlu0 %v700_v54, %s2598_s17  ;;  %864 = vrot.lane.b32.xlu1 %v829_v48, %s2597_s16  ;;  %v1193_v48 = vrot.slane %v1191_v35, 1  ;;  %v1428_v54 = vshll.u32 %v2912_v42, 16 }
  0x4d   : > { %v1194_v56 = vor.u32 %v1193_v48, %v1189_v46 }
  0x4f   : > { %862 = vrot.lane.b32.xlu0 %v826_v0, %s2597_s16  ;;  %787 = vrot.lane.b32.xlu1 %v736_v10, %s2598_s17  ;;  %v1430_v0 = vrot.slane %v1428_v54, 1  ;;  %v1199_v5 = vsel %vm568_vm3, %v1194_v56, %v1198_v58  ;;  %v1435_v10 = vrot.slane %v1433_v1, 1 }
  0x51   : > { %v1431_v8 = vor.u32 %v1430_v0, %v1426_v59 }
  0x53   : > { %785 = vrot.lane.b32.xlu0 %v724_v19, %s2598_s17  ;;  %868 = vrot.lane.b32.xlu1 %v835_v16, %s2597_s16  ;;  %v1436_v13 = vsel %vm568_vm3, %v1431_v8, %v1435_v10 }
  0x57   : > { %866 = vrot.lane.b32.xlu0 %v832_v36, %s2597_s16  ;;  %791 = vrot.lane.b32.xlu1 %v760_v39, %s2598_s17 }
  0x5b   : > { %789 = vrot.lane.b32.xlu0 %v748_v50, %s2598_s17  ;;  %872 = vrot.lane.b32.xlu1 %v841_v45, %s2597_s16 }
  0x5f   : > { %870 = vrot.lane.b32.xlu0 %v838_v55, %s2597_s16  ;;  %1205 = vrot.lane.b32.xlu1 %v1204_v63, %s2597_s16 }
  0x63   : > { %1200 = vrot.lane.b32.xlu0 %v1199_v5, %s2598_s17  ;;  %1442 = vrot.lane.b32.xlu1 %v1441_v11, %s2597_s16  ;;  %s1993_s16 = sshll.u32 %s327_s15, 7 }
  0x67   : > { %1437 = vrot.lane.b32.xlu0 %v1436_v13, %s2598_s17  ;;  %s3064_s17 = scalar_lea.vmem [#allocation2], %s1993_s16 }
  0x68   : > { %s1864_s25 = sshll.u32 %s3064_s17, 4  ;;  %s3163_s25 = int_to_ptr.vmem [resolvable:$true] %s1864_s25 }
  0x69   : > { %s2516_s8 = scalar_lea.vmem %s3163_s25, 2048  ;;  %p2523_p1 = scmp.lt.s32.totalorder %s3163_s25, %s2521_s10 }
  0x6a   : > { %p2517_p12 = scmp.ne.s32.totalorder %s3163_s25, %s2516_s8  ;;  %p2524_p2 = scmp.lt.s32.totalorder %s2522_s11, %s2516_s8 }
  0x6c   : > { %p2518_p13 = pnand %p2517_p12, %p2672_p4  ;;  %p2525_p3 = por %p2524_p2, %p2523_p1 }
  0x6e   : > { %p2519_p0 = pneg %p2518_p13 }
  0x70   : > { %p2526_p5 = pnand %p2525_p3, %p2519_p0 }
  0x91   : > { %v843_v14 = vpop.permute.xlu1 %842 }
  0x95   : > { %v762_v15 = vpop.permute.xlu0 %761  ;;  %v845_v16 = vpop.permute.xlu1 %844 }
  0x96   : > { %v876_v19 = vsel %vm874_vm4, %v2710_v7, %v762_v15 }
  0x97   : > { %v909_v20 = vsel %vm907_vm5, %v876_v19, %v843_v14 }
  0x98   : > { %2216 = vmatprep.mubr.msk.bf16.mxu1 %vm947_vm6, %v909_v20 }
  0x99   : > { %v764_v21 = vpop.permute.xlu0 %763  ;;  %v847_v22 = vpop.permute.xlu1 %846 }
  0x9a   : > { %v878_v25 = vsel %vm874_vm4, %v2715_v9, %v764_v21 }
  0x9b   : > { %v911_v27 = vsel %vm907_vm5, %v878_v25, %v845_v16 }
  0x9c   : > { %2217 = vmatmul.mubr.msk.bf16.vlgmr.msra.gmra.mrb[0].mxu1 %vm947_vm6, %v911_v27  ;;  %2250 = vmatprep.mubr.msk.bf16.mxu0 %vm947_vm6, %v911_v27 }
  0x9d   : > { %v766_v3 = vpop.permute.xlu0 %765  ;;  %2317 = vmatpush3.bf16.msra.mxu1 %v2707_v6  ;;  %v849_v28 = vpop.permute.xlu1 %848 }
  0x9e   : > { %v880_v7 = vsel %vm874_vm4, %v2729_v24, %v766_v3 }
  0x9f   : > { %v913_v29 = vsel %vm907_vm5, %v880_v7, %v847_v22 }
  0xa0   : > { %2220 = vmatprep.mubr.msk.bf16.mxu1 %vm947_vm6, %v913_v29  ;;  %2251 = vmatmul.mubr.msk.bf16.vlgmr.msra.gmra.mrb[0].mxu0 %vm947_vm6, %v913_v29 }
  0xa1   : > { %2283 = vmatpush3.bf16.msra.mxu0 %v2892_v18  ;;  %v768_v9 = vpop.permute.xlu0 %767  ;;  %v851_v31 = vpop.permute.xlu1 %850 }
  0xa2   : > { %v882_v33 = vsel %vm874_vm4, %v2736_v32, %v768_v9 }
  0xa3   : > { %v915_v35 = vsel %vm907_vm5, %v882_v33, %v849_v28 }
  0xa4   : > { %2221 = vmatmul.mubr.msk.bf16.gmra.mrb[4].mxu1 %vm947_vm6, %v915_v35  ;;  %2254 = vmatprep.mubr.msk.bf16.mxu0 %vm947_vm6, %v915_v35 }
  0xa5   : > { %v770_v6 = vpop.permute.xlu0 %769  ;;  %v853_v24 = vpop.permute.xlu1 %852 }
  0xa6   : > { %v884_v36 = vsel %vm874_vm4, %v2742_v38, %v770_v6 }
  0xa7   : > { %v917_v39 = vsel %vm907_vm5, %v884_v36, %v851_v31 }
  0xa8   : > { %2224 = vmatprep.mubr.msk.bf16.mxu1 %vm947_vm6, %v917_v39  ;;  %2255 = vmatmul.mubr.msk.bf16.gmra.mrb[4].mxu0 %vm947_vm6, %v917_v39 }
  0xa9   : > { %v772_v18 = vpop.permute.xlu0 %771  ;;  %v855_v40 = vpop.permute.xlu1 %854 }
  0xaa   : > { %v886_v32 = vsel %vm874_vm4, %v2758_v57, %v772_v18 }
  0xab   : > { %v919_v41 = vsel %vm907_vm5, %v886_v32, %v853_v24 }
  0xac   : > { %2225 = vmatmul.mubr.msk.bf16.gmra.mrb[8].mxu1 %vm947_vm6, %v919_v41  ;;  %2258 = vmatprep.mubr.msk.bf16.mxu0 %vm947_vm6, %v919_v41 }
  0xad   : > { %v774_v43 = vpop.permute.xlu0 %773  ;;  %v857_v44 = vpop.permute.xlu1 %856 }
  0xae   : > { %v888_v38 = vsel %vm874_vm4, %v2766_v4, %v774_v43 }
  0xaf   : > { %v921_v45 = vsel %vm907_vm5, %v888_v38, %v855_v40 }
  0xb0   : > { %2228 = vmatprep.mubr.msk.bf16.mxu1 %vm947_vm6, %v921_v45  ;;  %2259 = vmatmul.mubr.msk.bf16.gmra.mrb[8].mxu0 %vm947_vm6, %v921_v45 }
  0xb1   : > { %v776_v46 = vpop.permute.xlu0 %775  ;;  %v859_v48 = vpop.permute.xlu1 %858 }
  0xb2   : > { %v890_v57 = vsel %vm874_vm4, %v2772_v12, %v776_v46 }
  0xb3   : > { %v923_v49 = vsel %vm907_vm5, %v890_v57, %v857_v44 }
  0xb4   : > { %2229 = vmatmul.mubr.msk.bf16.gmra.mrb[12].mxu1 %vm947_vm6, %v923_v49  ;;  %2262 = vmatprep.mubr.msk.bf16.mxu0 %vm947_vm6, %v923_v49 }
  0xb5   : > { %v778_v50 = vpop.permute.xlu0 %777  ;;  %v861_v51 = vpop.permute.xlu1 %860 }
  0xb6   : > { %v892_v4 = vsel %vm874_vm4, %v2787_v30, %v778_v50 }
  0xb7   : > { %v925_v52 = vsel %vm907_vm5, %v892_v4, %v859_v48 }
  0xb8   : > { %2232 = vmatprep.mubr.msk.bf16.mxu1 %vm947_vm6, %v925_v52  ;;  %2263 = vmatmul.mubr.msk.bf16.gmra.mrb[12].mxu0 %vm947_vm6, %v925_v52 }
  0xb9   : > { %2284 = vmatprep.mubr.msk.bf16.mxu0 %vm947_vm6, %v913_v29  ;;  %v780_v12 = vpop.permute.xlu0 %779  ;;  %v784_v53 = vpop.permute.xlu1 %783 }
  0xba   : > { %v894_v54 = vsel %vm874_vm4, %v2792_v34, %v780_v12  ;;  %v898_v30 = vsel %vm874_vm4, %v2796_v37, %v784_v53 }
  0xbb   : > { %v927_v55 = vsel %vm907_vm5, %v894_v54, %v861_v51 }
  0xbc   : > { %2233 = vmatmul.mubr.msk.bf16.gmra.mrb[16].mxu1 %vm947_vm6, %v927_v55 }
  0xbd   : > { %v782_v56 = vpop.permute.xlu0 %781  ;;  %v865_v58 = vpop.permute.xlu1 %864 }
  0xbe   : > { %v896_v59 = vsel %vm874_vm4, %v2815_v61, %v782_v56  ;;  %v931_v62 = vsel %vm907_vm5, %v898_v30, %v865_v58 }
  0xc0   : > { %2285 = vmatmul.mubr.msk.bf16.vlgmr.msra.gmra.mrb[0].mxu0 %vm947_vm6, %v915_v35 }
  0xc1   : > { %2288 = vmatprep.mubr.msk.bf16.mxu0 %vm947_vm6, %v917_v39  ;;  %v863_v63 = vpop.permute.xlu0 %862  ;;  %v788_v34 = vpop.permute.xlu1 %787 }
  0xc2   : > { %v929_v0 = vsel %vm907_vm5, %v896_v59, %v863_v63  ;;  %v902_v37 = vsel %vm874_vm4, %v2828_v17, %v788_v34 }
  0xc3   : > { %2236 = vmatprep.mubr.msk.bf16.mxu1 %vm947_vm6, %v929_v0 }
  0xc4   : > { %2237 = vmatmul.mubr.msk.bf16.gmra.mrb[20].mxu1 %vm947_vm6, %v931_v62 }
  0xc5   : > { %v786_v1 = vpop.permute.xlu0 %785  ;;  %v869_v2 = vpop.permute.xlu1 %868 }
  0xc6   : > { %v900_v61 = vsel %vm874_vm4, %v2835_v26, %v786_v1  ;;  %v935_v5 = vsel %vm907_vm5, %v902_v37, %v869_v2 }
  0xc8   : > { %2289 = vmatmul.mubr.msk.bf16.gmra.mrb[4].mxu0 %vm947_vm6, %v919_v41  ;;  %v3054_v41 = vld [vmem:[%s3223_s4] ss:$0 sm:$0xff] }
  0xc9   : > { %2292 = vmatprep.mubr.msk.bf16.mxu0 %vm947_vm6, %v921_v45  ;;  %v867_v8 = vpop.permute.xlu0 %866  ;;  %v792_v10 = vpop.permute.xlu1 %791 }
  0xca   : > { %v933_v11 = vsel %vm907_vm5, %v900_v61, %v867_v8  ;;  %v906_v17 = vsel %vm874_vm4, %v2853_v47, %v792_v10 }
  0xcb   : > { %2240 = vmatprep.mubr.msk.bf16.mxu1 %vm947_vm6, %v933_v11 }
  0xcc   : > { %2241 = vmatmul.mubr.msk.bf16.gmra.mrb[24].mxu1 %vm947_vm6, %v935_v5 }
  0xcd   : > { %v790_v13 = vpop.permute.xlu0 %789  ;;  %v873_v14 = vpop.permute.xlu1 %872 }
  0xce   : > { %v904_v26 = vsel %vm874_vm4, %v2872_v60, %v790_v13  ;;  %v939_v15 = vsel %vm907_vm5, %v906_v17, %v873_v14 }
  0xd0   : > { %2293 = vmatmul.mubr.msk.bf16.gmra.mrb[8].mxu0 %vm947_vm6, %v923_v49 }
  0xd1   : > { %2296 = vmatprep.mubr.msk.bf16.mxu0 %vm947_vm6, %v925_v52  ;;  %v871_v16 = vpop.permute.xlu0 %870  ;;  %v1206_v20 = vpop.permute.xlu1 %1205 }
  0xd2   : > { %v937_v19 = vsel %vm907_vm5, %v904_v26, %v871_v16 }
  0xd3   : > { %2244 = vmatprep.mubr.msk.bf16.mxu1 %vm947_vm6, %v937_v19 }
  0xd4   : > { %2245 = vmatmul.mubr.msk.bf16.gmra.mrb[28].mxu1 %vm947_vm6, %v939_v15 }
  0xd5   : > { %2266 = vmatprep.mubr.msk.bf16.mxu1 %vm947_vm6, %v927_v55  ;;  %v1201_v47 = vpop.permute.xlu0 %1200  ;;  %v1443_v27 = vpop.permute.xlu1 %1442 }
  0xd6   : > { %v1208_v60 = vsel %vm874_vm4, %v2901_v23, %v1201_v47 }
  0xd7   : > { %v1210_v21 = vsel %vm907_vm5, %v1208_v60, %v1206_v20 }
  0xd8   : > { %2297 = vmatmul.mubr.msk.bf16.gmra.mrb[12].mxu0 %vm947_vm6, %v927_v55 }
  0xd9   : > { %2300 = vmatprep.mubr.msk.bf16.mxu0 %vm947_vm6, %v929_v0  ;;  %v1438_v22 = vpop.permute.xlu0 %1437 }
  0xda   : > { %v1445_v25 = vsel %vm874_vm4, %v2912_v42, %v1438_v22 }
  0xdb   : > { %v1447_v23 = vsel %vm907_vm5, %v1445_v25, %v1443_v27 }
  0xdc   : > { %2267 = vmatmul.mubr.msk.bf16.vlgmr.msra.gmra.mrb[16].mxu1 %vm947_vm6, %v929_v0 }
  0xdd   : > { %2270 = vmatprep.mubr.msk.bf16.mxu1 %vm947_vm6, %v931_v62 }
  0xe0   : > { %2301 = vmatmul.mubr.msk.bf16.gmra.mrb[16].mxu0 %vm947_vm6, %v931_v62 }
  0xe1   : > { %2304 = vmatprep.mubr.msk.bf16.mxu0 %vm947_vm6, %v933_v11 }
  0xe4   : > { %2271 = vmatmul.mubr.msk.bf16.gmra.mrb[20].mxu1 %vm947_vm6, %v933_v11 }
  0xe5   : > { %2274 = vmatprep.mubr.msk.bf16.mxu1 %vm947_vm6, %v935_v5 }
  0xe8   : > { %2305 = vmatmul.mubr.msk.bf16.gmra.mrb[20].mxu0 %vm947_vm6, %v935_v5 }
  0xe9   : > { %2308 = vmatprep.mubr.msk.bf16.mxu0 %vm947_vm6, %v937_v19 }
  0xec   : > { %2275 = vmatmul.mubr.msk.bf16.gmra.mrb[24].mxu1 %vm947_vm6, %v937_v19 }
  0xed   : > { %2278 = vmatprep.mubr.msk.bf16.mxu1 %vm947_vm6, %v939_v15 }
  0xf0   : > { %2309 = vmatmul.mubr.msk.bf16.gmra.mrb[24].mxu0 %vm947_vm6, %v939_v15 }
  0xf1   : > { %2312 = vmatprep.mubr.msk.bf16.mxu0 %vm947_vm6, %v1210_v21 }
  0xf4   : > { %2279 = vmatmul.mubr.msk.bf16.gmra.mrb[28].mxu1 %vm947_vm6, %v1210_v21 }
  0xf8   : > { %2313 = vmatmul.mubr.msk.bf16.gmra.mrb[28].mxu0 %vm947_vm6, %v1447_v23 }
 0x16f   : > { %v2218_v3 = vpop.f32.mrb[0].mxu1 }
 0x170   : > { %v1021_v28 = vpop.f32.mrb[1].mxu1  ;;  %v1150_v43 = vadd.f32 %v2218_v3, %v3054_v41 }
 0x171   : > { %v2219_v7 = vpop.f32.mrb[2].mxu1  ;;  %v1148_v44 = vadd.f32 %v3054_v41, %v1021_v28 }
 0x172   : > { %v1024_v29 = vpop.f32.mrb[3].mxu1  ;;  %v1151_v45 = vadd.f32 %v2219_v7, %v3054_v41 }
 0x173   : > { %v1149_v57 = vadd.f32 %v3054_v41, %v1024_v29 }
 0x177   : > { %v2222_v9 = vpop.f32.mrb[4].mxu1 }
 0x178   : > { %v1037_v31 = vpop.f32.mrb[5].mxu1  ;;  %v1154_v30 = vadd.f32 %v2222_v9, %v3054_v41 }
 0x179   : > { %v2223_v33 = vpop.f32.mrb[6].mxu1  ;;  %v1152_v62 = vadd.f32 %v3054_v41, %v1037_v31 }
 0x17a   : > { %v1040_v35 = vpop.f32.mrb[7].mxu1  ;;  %v1155_v0 = vadd.f32 %v2223_v33, %v3054_v41 }
 0x17b   : > { %v1153_v37 = vadd.f32 %v3054_v41, %v1040_v35 }
 0x17f   : > { %v2226_v6 = vpop.f32.mrb[8].mxu1 }
 0x180   : > { %v1053_v24 = vpop.f32.mrb[9].mxu1  ;;  %v1158_v19 = vadd.f32 %v2226_v6, %v3054_v41 }
 0x181   : > { %v2227_v42 = vpop.f32.mrb[10].mxu1  ;;  %v1156_v60 = vadd.f32 %v3054_v41, %v1053_v24 }
 0x182   : > { %v3041_v36 = vpop.f32.mrb[11].mxu1  ;;  %v1159_v22 = vadd.f32 %v2227_v42, %v3054_v41 }
 0x183   : > { %v1157_v23 = vadd.f32 %v3054_v41, %v3041_v36 }
 0x187   : > { %v3043_v39 = vpop.f32.mrb[12].mxu1 }
 0x188   : > { %v3045_v18 = vpop.f32.mrb[13].mxu1 }
 0x189   : > { %v3047_v40 = vpop.f32.mrb[14].mxu1 }
 0x18a   : > { %v3049_v32 = vpop.f32.mrb[15].mxu1 }
 0x193   : > { %v2286_v38 = vpop.f32.mrb[0].mxu0 }
 0x194   : > { %v2319_v46 = vadd.f32 %v2286_v38, %v1150_v43  ;;  %v1495_v48 = vpop.f32.mrb[1].mxu0  ;;  %v1162_v43 = vadd.f32 %v3043_v39, %v3054_v41  ;;  %v1161_v39 = vadd.f32 %v3054_v41, %v3049_v32 }
 0x195   : > { %v2321_v49 = vadd.f32 %v1495_v48, %v1148_v44  ;;  %v2287_v50 = vpop.f32.mrb[2].mxu0  ;;  %v1160_v44 = vadd.f32 %v3054_v41, %v3045_v18 }
 0x196   : > { %v1656_v51 = vmax.f32 %v2319_v46, 0.0  ;;  %v2323_v4 = vadd.f32 %v2287_v50, %v1151_v45  ;;  %v1498_v52 = vpop.f32.mrb[3].mxu0  ;;  %v1163_v46 = vadd.f32 %v3047_v40, %v3054_v41 }
 0x197   : > { %v1654_v12 = vmax.f32 %v2321_v49, 0.0  ;;  %v2325_v53 = vadd.f32 %v1498_v52, %v1149_v57 }
 0x198   : > { %v2132_v54 = vpack.c.bf16 %v1656_v51, %v1656_v51  ;;  %v1657_v55 = vmax.f32 %v2323_v4, 0.0 }
 0x199   : > { %v2130_v56 = vpack.c.bf16 %v1654_v12, %v1654_v12  ;;  %v1655_v58 = vmax.f32 %v2325_v53, 0.0 }
 0x19a   : > { %1817 = vst.msk [vmem:[%s3064_s17 + $0x8] sm:$0xf] %vm1814_vm7, %v2132_v54  ;;  %v2133_v59 = vpack.c.bf16 %v1657_v55, %v1657_v55 }
 0x19b   : > { %1815 = vst.msk [vmem:[%s3064_s17] sm:$0xf] %vm1814_vm7, %v2130_v56  ;;  %v2131_v63 = vpack.c.bf16 %v1655_v58, %v1655_v58  ;;  %v2290_v34 = vpop.f32.mrb[4].mxu0 }
 0x19c   : > { %1818 = vst.msk [vmem:[%s3064_s17 + $0xc] sm:$0xf] %vm1814_vm7, %v2133_v59  ;;  %v2327_v1 = vadd.f32 %v2290_v34, %v1154_v30  ;;  %v1511_v2 = vpop.f32.mrb[5].mxu0 }
 0x19d   : > { %1816 = vst.msk [vmem:[%s3064_s17 + $0x4] sm:$0xf] %vm1814_vm7, %v2131_v63  ;;  %v2329_v61 = vadd.f32 %v1511_v2, %v1152_v62  ;;  %v2291_v5 = vpop.f32.mrb[6].mxu0 }
 0x19e   : > { %v1660_v8 = vmax.f32 %v2327_v1, 0.0  ;;  %v2331_v10 = vadd.f32 %v2291_v5, %v1155_v0  ;;  %v1514_v11 = vpop.f32.mrb[7].mxu0 }
 0x19f   : > { %v1658_v13 = vmax.f32 %v2329_v61, 0.0  ;;  %v2333_v17 = vadd.f32 %v1514_v11, %v1153_v37 }
 0x1a0   : > { %v2136_v14 = vpack.c.bf16 %v1660_v8, %v1660_v8  ;;  %v1661_v26 = vmax.f32 %v2331_v10, 0.0 }
 0x1a1   : > { %v2134_v15 = vpack.c.bf16 %v1658_v13, %v1658_v13  ;;  %v1659_v16 = vmax.f32 %v2333_v17, 0.0 }
 0x1a2   : > { %1821 = vst.msk [vmem:[%s3064_s17 + $0x18] sm:$0xf] %vm1814_vm7, %v2136_v14  ;;  %v2137_v47 = vpack.c.bf16 %v1661_v26, %v1661_v26 }
 0x1a3   : > { %1819 = vst.msk [vmem:[%s3064_s17 + $0x10] sm:$0xf] %vm1814_vm7, %v2134_v15  ;;  %v2135_v20 = vpack.c.bf16 %v1659_v16, %v1659_v16  ;;  %v2294_v21 = vpop.f32.mrb[8].mxu0 }
 0x1a4   : > { %1822 = vst.msk [vmem:[%s3064_s17 + $0x1c] sm:$0xf] %vm1814_vm7, %v2137_v47  ;;  %v2335_v25 = vadd.f32 %v2294_v21, %v1158_v19  ;;  %v1527_v27 = vpop.f32.mrb[9].mxu0 }
 0x1a5   : > { %1820 = vst.msk [vmem:[%s3064_s17 + $0x14] sm:$0xf] %vm1814_vm7, %v2135_v20  ;;  %v2337_v3 = vadd.f32 %v1527_v27, %v1156_v60  ;;  %v2295_v28 = vpop.f32.mrb[10].mxu0 }
 0x1a6   : > { %v1664_v7 = vmax.f32 %v2335_v25, 0.0  ;;  %v2339_v29 = vadd.f32 %v2295_v28, %v1159_v22  ;;  %v1530_v9 = vpop.f32.mrb[11].mxu0 }
 0x1a7   : > { %v1662_v31 = vmax.f32 %v2337_v3, 0.0  ;;  %v2341_v33 = vadd.f32 %v1530_v9, %v1157_v23 }
 0x1a8   : > { %v2140_v35 = vpack.c.bf16 %v1664_v7, %v1664_v7  ;;  %v1665_v6 = vmax.f32 %v2339_v29, 0.0 }
 0x1a9   : > { %v2138_v24 = vpack.c.bf16 %v1662_v31, %v1662_v31  ;;  %v1663_v42 = vmax.f32 %v2341_v33, 0.0 }
 0x1aa   : > { %1825 = vst.msk [vmem:[%s3064_s17 + $0x28] sm:$0xf] %vm1814_vm7, %v2140_v35  ;;  %v2141_v36 = vpack.c.bf16 %v1665_v6, %v1665_v6 }
 0x1ab   : > { %1823 = vst.msk [vmem:[%s3064_s17 + $0x20] sm:$0xf] %vm1814_vm7, %v2138_v24  ;;  %v2139_v38 = vpack.c.bf16 %v1663_v42, %v1663_v42  ;;  %v2298_v45 = vpop.f32.mrb[12].mxu0 }
 0x1ac   : > { %1826 = vst.msk [vmem:[%s3064_s17 + $0x2c] sm:$0xf] %vm1814_vm7, %v2141_v36  ;;  %v2343_v48 = vadd.f32 %v2298_v45, %v1162_v43  ;;  %v1543_v57 = vpop.f32.mrb[13].mxu0 }
 0x1ad   : > { %1824 = vst.msk [vmem:[%s3064_s17 + $0x24] sm:$0xf] %vm1814_vm7, %v2139_v38  ;;  %v2345_v49 = vadd.f32 %v1543_v57, %v1160_v44  ;;  %v2299_v50 = vpop.f32.mrb[14].mxu0 }
 0x1ae   : > { %v1668_v18 = vmax.f32 %v2343_v48, 0.0  ;;  %v2347_v51 = vadd.f32 %v2299_v50, %v1163_v46  ;;  %v1546_v4 = vpop.f32.mrb[15].mxu0 }
 0x1af   : > { %v1666_v52 = vmax.f32 %v2345_v49, 0.0  ;;  %v2349_v12 = vadd.f32 %v1546_v4, %v1161_v39  ;;  %v2268_v40 = vpop.f32.mrb[16].mxu1 }
 0x1b0   : > { %v2144_v53 = vpack.c.bf16 %v1668_v18, %v1668_v18  ;;  %v1669_v54 = vmax.f32 %v2347_v51, 0.0  ;;  %v1322_v55 = vpop.f32.mrb[17].mxu1  ;;  %v2350_v59 = vadd.f32 %v2268_v40, %v3054_v41 }
 0x1b1   : > { %v2142_v56 = vpack.c.bf16 %v1666_v52, %v1666_v52  ;;  %v1667_v58 = vmax.f32 %v2349_v12, 0.0  ;;  %v2269_v32 = vpop.f32.mrb[18].mxu1  ;;  %v2352_v34 = vadd.f32 %v3054_v41, %v1322_v55 }
 0x1b2   : > { %1829 = vst.msk [vmem:[%s3064_s17 + $0x38] sm:$0xf] %vm1814_vm7, %v2144_v53  ;;  %v2145_v30 = vpack.c.bf16 %v1669_v54, %v1669_v54  ;;  %v1325_v62 = vpop.f32.mrb[19].mxu1  ;;  %v2354_v1 = vadd.f32 %v2269_v32, %v3054_v41 }
 0x1b3   : > { %1827 = vst.msk [vmem:[%s3064_s17 + $0x30] sm:$0xf] %vm1814_vm7, %v2142_v56  ;;  %v2143_v63 = vpack.c.bf16 %v1667_v58, %v1667_v58  ;;  %v2302_v0 = vpop.f32.mrb[16].mxu0  ;;  %v2356_v61 = vadd.f32 %v3054_v41, %v1325_v62 }
 0x1b4   : > { %1830 = vst.msk [vmem:[%s3064_s17 + $0x3c] sm:$0xf] %vm1814_vm7, %v2145_v30  ;;  %v2351_v2 = vadd.f32 %v2350_v59, %v2302_v0  ;;  %v1559_v37 = vpop.f32.mrb[17].mxu0 }
 0x1b5   : > { %1828 = vst.msk [vmem:[%s3064_s17 + $0x34] sm:$0xf] %vm1814_vm7, %v2143_v63  ;;  %v2353_v5 = vadd.f32 %v2352_v34, %v1559_v37  ;;  %v2303_v8 = vpop.f32.mrb[18].mxu0 }
 0x1b6   : > { %v1672_v10 = vmax.f32 %v2351_v2, 0.0  ;;  %v2355_v11 = vadd.f32 %v2354_v1, %v2303_v8  ;;  %v1562_v13 = vpop.f32.mrb[19].mxu0 }
 0x1b7   : > { %v1670_v17 = vmax.f32 %v2353_v5, 0.0  ;;  %v2357_v14 = vadd.f32 %v2356_v61, %v1562_v13  ;;  %v2272_v26 = vpop.f32.mrb[20].mxu1 }
 0x1b8   : > { %v2148_v15 = vpack.c.bf16 %v1672_v10, %v1672_v10  ;;  %v1673_v16 = vmax.f32 %v2355_v11, 0.0  ;;  %v1338_v19 = vpop.f32.mrb[21].mxu1  ;;  %v2358_v22 = vadd.f32 %v2272_v26, %v3054_v41 }
 0x1b9   : > { %v2146_v47 = vpack.c.bf16 %v1670_v17, %v1670_v17  ;;  %v1671_v60 = vmax.f32 %v2357_v14, 0.0  ;;  %v2273_v20 = vpop.f32.mrb[22].mxu1  ;;  %v2360_v23 = vadd.f32 %v3054_v41, %v1338_v19 }
 0x1ba   : > { %1833 = vst.msk [vmem:[%s3064_s17 + $0x48] sm:$0xf] %vm1814_vm7, %v2148_v15  ;;  %v2149_v21 = vpack.c.bf16 %v1673_v16, %v1673_v16  ;;  %v1341_v25 = vpop.f32.mrb[23].mxu1  ;;  %v2362_v28 = vadd.f32 %v2273_v20, %v3054_v41 }
 0x1bb   : > { %1831 = vst.msk [vmem:[%s3064_s17 + $0x40] sm:$0xf] %vm1814_vm7, %v2146_v47  ;;  %v2147_v27 = vpack.c.bf16 %v1671_v60, %v1671_v60  ;;  %v2306_v3 = vpop.f32.mrb[20].mxu0  ;;  %v2364_v9 = vadd.f32 %v3054_v41, %v1341_v25 }
 0x1bc   : > { %1834 = vst.msk [vmem:[%s3064_s17 + $0x4c] sm:$0xf] %vm1814_vm7, %v2149_v21  ;;  %v2359_v7 = vadd.f32 %v2358_v22, %v2306_v3  ;;  %v1575_v29 = vpop.f32.mrb[21].mxu0 }
 0x1bd   : > { %1832 = vst.msk [vmem:[%s3064_s17 + $0x44] sm:$0xf] %vm1814_vm7, %v2147_v27  ;;  %v2361_v31 = vadd.f32 %v2360_v23, %v1575_v29  ;;  %v2307_v33 = vpop.f32.mrb[22].mxu0 }
 0x1be   : > { %v1676_v35 = vmax.f32 %v2359_v7, 0.0  ;;  %v2363_v6 = vadd.f32 %v2362_v28, %v2307_v33  ;;  %v1578_v24 = vpop.f32.mrb[23].mxu0 }
 0x1bf   : > { %v1674_v42 = vmax.f32 %v2361_v31, 0.0  ;;  %v2365_v43 = vadd.f32 %v2364_v9, %v1578_v24  ;;  %v2276_v36 = vpop.f32.mrb[24].mxu1 }
 0x1c0   : > { %v2152_v44 = vpack.c.bf16 %v1676_v35, %v1676_v35  ;;  %v1677_v38 = vmax.f32 %v2363_v6, 0.0  ;;  %v1354_v45 = vpop.f32.mrb[25].mxu1  ;;  %v2366_v49 = vadd.f32 %v2276_v36, %v3054_v41 }
 0x1c1   : > { %v2150_v46 = vpack.c.bf16 %v1674_v42, %v1674_v42  ;;  %v1675_v48 = vmax.f32 %v2365_v43, 0.0  ;;  %v2277_v57 = vpop.f32.mrb[26].mxu1  ;;  %v2368_v51 = vadd.f32 %v3054_v41, %v1354_v45 }
 0x1c2   : > { %1837 = vst.msk [vmem:[%s3064_s17 + $0x58] sm:$0xf] %vm1814_vm7, %v2152_v44  ;;  %v2153_v39 = vpack.c.bf16 %v1677_v38, %v1677_v38  ;;  %v1357_v50 = vpop.f32.mrb[27].mxu1  ;;  %v2370_v52 = vadd.f32 %v2277_v57, %v3054_v41 }
 0x1c3   : > { %1835 = vst.msk [vmem:[%s3064_s17 + $0x50] sm:$0xf] %vm1814_vm7, %v2150_v46  ;;  %v2151_v18 = vpack.c.bf16 %v1675_v48, %v1675_v48  ;;  %v2310_v4 = vpop.f32.mrb[24].mxu0  ;;  %v2372_v53 = vadd.f32 %v3054_v41, %v1357_v50 }
 0x1c4   : > { %1838 = vst.msk [vmem:[%s3064_s17 + $0x5c] sm:$0xf] %vm1814_vm7, %v2153_v39  ;;  %v2367_v12 = vadd.f32 %v2366_v49, %v2310_v4  ;;  %v1591_v40 = vpop.f32.mrb[25].mxu0 }
 0x1c5   : > { %1836 = vst.msk [vmem:[%s3064_s17 + $0x54] sm:$0xf] %vm1814_vm7, %v2151_v18  ;;  %v2369_v54 = vadd.f32 %v2368_v51, %v1591_v40  ;;  %v2311_v55 = vpop.f32.mrb[26].mxu0 }
 0x1c6   : > { %v1680_v56 = vmax.f32 %v2367_v12, 0.0  ;;  %v2371_v58 = vadd.f32 %v2370_v52, %v2311_v55  ;;  %v1594_v32 = vpop.f32.mrb[27].mxu0 }
 0x1c7   : > { %v1678_v30 = vmax.f32 %v2369_v54, 0.0  ;;  %v2373_v59 = vadd.f32 %v2372_v53, %v1594_v32  ;;  %v2280_v62 = vpop.f32.mrb[28].mxu1 }
 0x1c8   : > { %v2156_v63 = vpack.c.bf16 %v1680_v56, %v1680_v56  ;;  %v1681_v34 = vmax.f32 %v2371_v58, 0.0  ;;  %v1370_v0 = vpop.f32.mrb[29].mxu1  ;;  %v2374_v5 = vadd.f32 %v2280_v62, %v3054_v41 }
 0x1c9   : > { %v2154_v1 = vpack.c.bf16 %v1678_v30, %v1678_v30  ;;  %v1679_v2 = vmax.f32 %v2373_v59, 0.0  ;;  %v2281_v37 = vpop.f32.mrb[30].mxu1  ;;  %v2376_v11 = vadd.f32 %v3054_v41, %v1370_v0 }
 0x1ca   : > { %1841 = vst.msk [vmem:[%s3064_s17 + $0x68] sm:$0xf] %vm1814_vm7, %v2156_v63  ;;  %v2157_v61 = vpack.c.bf16 %v1681_v34, %v1681_v34  ;;  %v1373_v8 = vpop.f32.mrb[31].mxu1  ;;  %v2378_v17 = vadd.f32 %v2281_v37, %v3054_v41 }
 0x1cb   : > { %1839 = vst.msk [vmem:[%s3064_s17 + $0x60] sm:$0xf] %vm1814_vm7, %v2154_v1  ;;  %v2155_v10 = vpack.c.bf16 %v1679_v2, %v1679_v2  ;;  %v2314_v13 = vpop.f32.mrb[28].mxu0  ;;  %v2380_v15 = vadd.f32 %v3054_v41, %v1373_v8 }
 0x1cc   : > { %1842 = vst.msk [vmem:[%s3064_s17 + $0x6c] sm:$0xf] %vm1814_vm7, %v2157_v61  ;;  %v2375_v14 = vadd.f32 %v2374_v5, %v2314_v13  ;;  %v1607_v26 = vpop.f32.mrb[29].mxu0 }
 0x1cd   : > { %1840 = vst.msk [vmem:[%s3064_s17 + $0x64] sm:$0xf] %vm1814_vm7, %v2155_v10  ;;  %v2377_v16 = vadd.f32 %v2376_v11, %v1607_v26  ;;  %v2315_v19 = vpop.f32.mrb[30].mxu0 }
 0x1ce   : > { %v1684_v47 = vmax.f32 %v2375_v14, 0.0  ;;  %v2379_v60 = vadd.f32 %v2378_v17, %v2315_v19  ;;  %v1610_v20 = vpop.f32.mrb[31].mxu0 }
 0x1cf   : > { %v1682_v21 = vmax.f32 %v2377_v16, 0.0  ;;  %v2381_v22 = vadd.f32 %v2380_v15, %v1610_v20 }
 0x1d0   : > { %v2160_v25 = vpack.c.bf16 %v1684_v47, %v1684_v47  ;;  %v1685_v27 = vmax.f32 %v2379_v60, 0.0 }
 0x1d1   : > { %v2158_v23 = vpack.c.bf16 %v1682_v21, %v1682_v21  ;;  %v1683_v3 = vmax.f32 %v2381_v22, 0.0 }
 0x1d2   : > { %1845 = vst.msk [vmem:[%s3064_s17 + $0x78] sm:$0xf] %vm1814_vm7, %v2160_v25  ;;  %v2161_v41 = vpack.c.bf16 %v1685_v27, %v1685_v27 }
 0x1d3   : > { %1843 = vst.msk [vmem:[%s3064_s17 + $0x70] sm:$0xf] %vm1814_vm7, %v2158_v23  ;;  %v2159_v28 = vpack.c.bf16 %v1683_v3, %v1683_v3 }
 0x1d4   : > { %1846 = vst.msk [vmem:[%s3064_s17 + $0x7c] sm:$0xf] %vm1814_vm7, %v2161_v41 }
 0x1d5   : > { %1844 = vst.msk [vmem:[%s3064_s17 + $0x74] sm:$0xf] %vm1814_vm7, %v2159_v28 }
 0x1d6   : > { %2529 = shalt.err (!%p2526_p5)
}
 0x1d7   : > { %s2530_s12 = scalar_lea.hbm %s3161_s7, 2048  ;;  %s2534_s15 = scalar_lea.hbm %s3224_s5, 4096 }
 0x1d8   : > { %p2531_p6 = scmp.ne.s32.totalorder %s3161_s7, %s2530_s12  ;;  %p2535_p10 = scmp.lt.u32.totalorder %s3161_s7, %s3224_s5 }
 0x1d9   : > { %p2536_p11 = scmp.lt.u32.totalorder %s2534_s15, %s2530_s12  ;;  %p2538_p13 = scmp.lt.u32.totalorder %s2530_s12, %s3161_s7 }
 0x1da   : > { %p2532_p7 = pnand %p2531_p6, %p2672_p4 }
 0x1db   : > { %p2537_p12 = por %p2536_p11, %p2535_p10 }
 0x1dc   : > { %p2533_p9 = pneg %p2532_p7 }
 0x1dd   : > { %p2539_p0 = por %p2538_p13, %p2537_p12 }
 0x1df   : > { %p2540_p1 = pnand %p2539_p0, %p2533_p9 }
 0x1e1   : > { %2543 = shalt.err (!%p2540_p1)
}
 0x1e2   : > { %s2600_s24 = smov 64   ;;  %s2601_s27 = smov 4  }
 0x1e3   : > { %2416 = dma.vmem_to_hbm [thread:$0]  (%p2672_p4), %s3163_s25, 2048, %s3161_s7, %s3173_s21, %s2600_s24, %s2600_s24, %s2601_s27  }
 0x1e4 PF: > { %p2423_p2 = scmp.ge.s32.totalorder %s2594_s23, 2  ;;  %s1879_s29 = sand.u32 1, %s2574_s18  }
 0x1e5   : > { %s1880_s8 = scalar_lea.sflag [#allocation3], %s1879_s29 }
 0x1e6   : > { %p2419_p3 = pnand %p2423_p2, %p2679_p8 }
 0x1e8   : > { %2569 = dma.done.wait (!%p2419_p3), %s1880_s8, 2048  }
 0x1e9   : > { %2571 = vsyncadd (!%p2419_p3), %s1880_s8, 4294965248  ;;  %s18_s23 = sadd.s32 1, %s2594_s23   ;;  %s3227_s18 = smov %s2578_s19 }
 0x1ea   : > { %p15_p5 = scmp.ge.s32.totalorder %s18_s23, 4   ;;  %s3228_s19 = smov %s2582_s20 }
 0x1eb   : > { %s3229_s20 = smov %s2685_s6  ;;  %s3230_s21 = smov %s2590_s22 }
 0x1ec   : > { %s3231_s22 = smov %s3233_s26  ;;  %17 = sbr.rel (!%p15_p5) target bundleno = 4 (0x4), region = 83 }
 0x1f3   :  { %1885 = vsyncpa [#allocation3], 1 }
 0x1f4   :  { %1887 = vsyncpa [#allocation3 + $0x1], 1 }

</bundles_post_ra>
